<compile_context>
chip_gen: v7x
topology: tpu7x:2x2x1
jax: 0.10.0
libtpu: 0.0.40
codegen_flags: <defaults>
</compile_context>

<pallas_src>
import functools

import jax
import jax.numpy as jnp
from jax import lax
from jax.experimental import pallas as pl
from jax.experimental.pallas import tpu as pltpu


# 3x3 tap offsets (dh, dw), row-major — must match the weight packing order
# used in pack_image_model_params: weight column (kh*3 + kw)*Cin + c, kh=dh+1.
_TAPS = tuple((dh, dw) for dh in (-1, 0, 1) for dw in (-1, 0, 1))


# ---------------------------------------------------------------------------
# Fused Pallas kernel: [Conv2d(3x3, s=1, p=1) + bias + ReLU] x num_layers
# ---------------------------------------------------------------------------
def fused_image_model_kernel(*refs, W, num_layers):
    # refs = [x, masks, w_0, b_0, ..., w_{L-1}, b_{L-1}, out]
    #   x     : (C0, N*H*W)       f32   channels on sublanes, batch*spatial lanes
    #   masks : (9, N*H*W)        f32   per-tap zero-padding validity masks
    #   w_i   : (C_{i+1}, 9*C_i)  bf16  im2col-packed conv weights
    #   b_i   : (C_{i+1}, 1)      f32
    #   out   : (C_L, N*H*W)      f32   lane-dense (N*H*W multiple of 128)
    x_ref = refs[0]
    masks_ref = refs[1]
    w_refs = [refs[2 + 2 * i] for i in range(num_layers)]
    b_refs = [refs[3 + 2 * i] for i in range(num_layers)]
    o_ref = refs[2 + 2 * num_layers]

    total = x_ref.shape[1]              # N * H * W lanes
    masks = masks_ref[...]              # (9, total), loaded once

    act = x_ref[...]                    # (C0, total) f32
    for i in range(num_layers):
        # Build the (9*Cin, N*H*W) im2col slab as a value (vregs only):
        # one lane-roll (XLU slot) + one mask multiply (VPU) per tap.  Lanes
        # whose tap falls outside their own image — including lanes that
        # wrapped across image boundaries in the circular roll — are zeroed
        # by the per-image masks, so this is exact zero padding.
        cols = []
        for t, (dh, dw) in enumerate(_TAPS):
            d = dh * W + dw
            if d == 0:
                cols.append(act)                               # centre tap
            else:
                cols.append(pltpu.roll(act, (-d) % total, 1) * masks[t:t + 1, :])
        col = jnp.concatenate(cols, axis=0).astype(jnp.bfloat16)  # (9*Cin, total)

        # One lane-dense MXU matmul per layer for the whole batch:
        # (Cout, 9*Cin) x (9*Cin, N*H*W) -> (Cout, N*H*W), f32 accumulation.
        acc = jnp.dot(w_refs[i][...], col, preferred_element_type=jnp.float32)
        act = jnp.maximum(acc + b_refs[i][...], 0.0)           # bias + ReLU
    o_ref[...] = act.astype(o_ref.dtype)


# ---------------------------------------------------------------------------
# Host-side prep (done ONCE, outside the jitted forward)
# ---------------------------------------------------------------------------
def pack_image_model_params(params):
    """(Cout, Cin, 3, 3) PyTorch-layout weights -> (Cout, 9*Cin) bf16 matrices
    (+ (Cout, 1) f32 biases), im2col-packed to match _TAPS order."""
    packed = []
    for w, b in params:
        cout, cin, kh, kw = w.shape
        wm = (jnp.transpose(w, (0, 2, 3, 1))
              .reshape(cout, kh * kw * cin)
              .astype(jnp.bfloat16))
        bm = b.reshape(cout, 1).astype(jnp.float32)
        packed.append((wm, bm))
    return packed


def make_tap_masks(N, H, W):
    """(9, N*H*W) f32 validity masks for zero padding, per-image positions."""
    HW = H * W
    pos = jnp.arange(N * HW, dtype=jnp.int32)[None, :]
    q = pos % HW                           # per-image flattened position
    col = q % W                            # per-image column index
    masks = []
    for dh, dw in _TAPS:
        vert = (q >= -dh * W) & (q < (H - dh) * W)      # 0 <= h+dh < H
        horz = (col >= -dw) & (col < W - dw)            # 0 <= w+dw < W
        masks.append((vert & horz).astype(jnp.float32))
    return jnp.concatenate(masks, axis=0)


# ---------------------------------------------------------------------------
# Wrapper: single fused pallas_call (no grid — whole problem fits in VMEM)
# ---------------------------------------------------------------------------
@jax.jit
def image_model_forward(x_nchw, packed_params, masks):
    """Matches ImageModel.forward(x): sequentially apply each conv+ReLU layer.

    x_nchw        : (N, C, H, W) float32 (PyTorch NCHW layout).
    packed_params : output of pack_image_model_params.
    masks         : output of make_tap_masks(N, H, W).
    """
    N, C0, H, W = x_nchw.shape
    total = N * H * W
    # Fold the batch onto the lane axis: (C0, N*H*W), channels on sublanes.
    x_fold = jnp.transpose(x_nchw, (1, 0, 2, 3)).reshape(C0, total)

    inputs = [x_fold, masks]
    c_out = C0
    for wm, bm in packed_params:
        inputs += [wm, bm]
        c_out = wm.shape[0]

    kernel = functools.partial(fused_image_model_kernel, W=W,
                               num_layers=len(packed_params))
    out = pl.pallas_call(
        kernel,
        out_shape=jax.ShapeDtypeStruct((c_out, total), jnp.float32),
    )(*inputs)
    # Back to NCHW (cheap wrapper-side layout plumbing).
    return jnp.transpose(out.reshape(c_out, N, H, W), (1, 0, 2, 3))


# ---------------------------------------------------------------------------
# Deterministic parameter construction + pure-JAX reference
# ---------------------------------------------------------------------------
def init_image_model_params(in_channels, out_channels_list, key):
    """Deterministic Conv2d weights (OIHW, PyTorch layout) + biases."""
    params = []
    cin = in_channels
    for i, cout in enumerate(out_channels_list):
        wk, bk = jax.random.split(jax.random.fold_in(key, i))
        fan_in = 3 * 3 * cin
        w = jax.random.normal(wk, (cout, cin, 3, 3), jnp.float32)
        w = w * (2.0 / fan_in) ** 0.5                    # kaiming-like scale
        b = 0.01 * jax.random.normal(bk, (cout,), jnp.float32)
        params.append((w, b))
        cin = cout
    return params


def image_model_forward_ref(x_nchw, params):
    x = x_nchw
    for w, b in params:
        y = lax.conv_general_dilated(
            x, w, window_strides=(1, 1), padding="SAME",
            dimension_numbers=("NCHW", "OIHW", "NCHW"))
        x = jnp.maximum(y + b[None, :, None, None], 0.0)
    return x


if __name__ == "__main__":
    key = jax.random.PRNGKey(0)
    xkey, pkey = jax.random.split(key)

    # in_shape = (4, 16, 16)  ->  x: (batch=2, C=4, H=16, W=16)  (NCHW)
    N, C0, H, W = 2, 4, 16, 16
    x = jax.random.normal(xkey, (N, C0, H, W), jnp.float32)

    # config -> two Conv2d(3x3, s=1, p=1)+ReLU layers: 4 -> 8 -> 16 channels
    params = init_image_model_params(in_channels=C0,
                                     out_channels_list=[8, 16],
                                     key=pkey)

    # One-time host-side prep (kept outside the jitted forward).
    packed_params = pack_image_model_params(params)
    masks = make_tap_masks(N, H, W)

    out = jax.block_until_ready(image_model_forward(x, packed_params, masks))
    ref = jax.block_until_ready(image_model_forward_ref(x, params))

    assert out.shape == ref.shape == (2, 16, 16, 16), (out.shape, ref.shape)
    # bf16 MXU operands with f32 accumulation (K <= 72).
    assert jnp.allclose(out, ref, atol=2e-2, rtol=2e-2), (
        float(jnp.max(jnp.abs(out - ref))))
    print("KERNEL_OK")
</pallas_src>

<mosaic_0001>
module attributes {stable_mosaic.version = 11 : i64} {
  func.func @fused_image_model_kernel(%arg0: memref<4x512xf32, #tpu.memory_space<vmem>>, %arg1: memref<9x512xf32, #tpu.memory_space<vmem>>, %arg2: memref<8x36xbf16, #tpu.memory_space<vmem>>, %arg3: memref<8x1xf32, #tpu.memory_space<vmem>>, %arg4: memref<16x72xbf16, #tpu.memory_space<vmem>>, %arg5: memref<16x1xf32, #tpu.memory_space<vmem>>, %arg6: memref<16x512xf32, #tpu.memory_space<vmem>>) attributes {dimension_semantics = [], scalar_prefetch = 0 : i64, scratch_operands = 0 : i64, tpu.core_type = #tpu.core_type<tc>} {
    %c0 = arith.constant 0 : index
    %c0_0 = arith.constant 0 : index
    %0 = vector.load %arg1[%c0, %c0_0] : memref<9x512xf32, #tpu.memory_space<vmem>>, vector<9x512xf32>
    %c0_1 = arith.constant 0 : index
    %c0_2 = arith.constant 0 : index
    %1 = vector.load %arg0[%c0_1, %c0_2] : memref<4x512xf32, #tpu.memory_space<vmem>>, vector<4x512xf32>
    %c17_i32 = arith.constant 17 : i32
    %2 = tpu.dynamic_rotate %1 by %c17_i32 dim 1 : vector<4x512xf32>, i32 -> vector<4x512xf32>
    %3 = vector.extract_strided_slice %0 {offsets = [0, 0], sizes = [1, 512], strides = [1, 1]} : vector<9x512xf32> to vector<1x512xf32>
    %4 = vector.broadcast %3 : vector<1x512xf32> to vector<4x512xf32>
    %5 = arith.mulf %2, %4 : vector<4x512xf32>
    %c16_i32 = arith.constant 16 : i32
    %6 = tpu.dynamic_rotate %1 by %c16_i32 dim 1 : vector<4x512xf32>, i32 -> vector<4x512xf32>
    %7 = vector.extract_strided_slice %0 {offsets = [1, 0], sizes = [1, 512], strides = [1, 1]} : vector<9x512xf32> to vector<1x512xf32>
    %8 = vector.broadcast %7 : vector<1x512xf32> to vector<4x512xf32>
    %9 = arith.mulf %6, %8 : vector<4x512xf32>
    %c15_i32 = arith.constant 15 : i32
    %10 = tpu.dynamic_rotate %1 by %c15_i32 dim 1 : vector<4x512xf32>, i32 -> vector<4x512xf32>
    %11 = vector.extract_strided_slice %0 {offsets = [2, 0], sizes = [1, 512], strides = [1, 1]} : vector<9x512xf32> to vector<1x512xf32>
    %12 = vector.broadcast %11 : vector<1x512xf32> to vector<4x512xf32>
    %13 = arith.mulf %10, %12 : vector<4x512xf32>
    %c1_i32 = arith.constant 1 : i32
    %14 = tpu.dynamic_rotate %1 by %c1_i32 dim 1 : vector<4x512xf32>, i32 -> vector<4x512xf32>
    %15 = vector.extract_strided_slice %0 {offsets = [3, 0], sizes = [1, 512], strides = [1, 1]} : vector<9x512xf32> to vector<1x512xf32>
    %16 = vector.broadcast %15 : vector<1x512xf32> to vector<4x512xf32>
    %17 = arith.mulf %14, %16 : vector<4x512xf32>
    %c511_i32 = arith.constant 511 : i32
    %18 = tpu.dynamic_rotate %1 by %c511_i32 dim 1 : vector<4x512xf32>, i32 -> vector<4x512xf32>
    %19 = vector.extract_strided_slice %0 {offsets = [5, 0], sizes = [1, 512], strides = [1, 1]} : vector<9x512xf32> to vector<1x512xf32>
    %20 = vector.broadcast %19 : vector<1x512xf32> to vector<4x512xf32>
    %21 = arith.mulf %18, %20 : vector<4x512xf32>
    %c497_i32 = arith.constant 497 : i32
    %22 = tpu.dynamic_rotate %1 by %c497_i32 dim 1 : vector<4x512xf32>, i32 -> vector<4x512xf32>
    %23 = vector.extract_strided_slice %0 {offsets = [6, 0], sizes = [1, 512], strides = [1, 1]} : vector<9x512xf32> to vector<1x512xf32>
    %24 = vector.broadcast %23 : vector<1x512xf32> to vector<4x512xf32>
    %25 = arith.mulf %22, %24 : vector<4x512xf32>
    %c496_i32 = arith.constant 496 : i32
    %26 = tpu.dynamic_rotate %1 by %c496_i32 dim 1 : vector<4x512xf32>, i32 -> vector<4x512xf32>
    %27 = vector.extract_strided_slice %0 {offsets = [7, 0], sizes = [1, 512], strides = [1, 1]} : vector<9x512xf32> to vector<1x512xf32>
    %28 = vector.broadcast %27 : vector<1x512xf32> to vector<4x512xf32>
    %29 = arith.mulf %26, %28 : vector<4x512xf32>
    %c495_i32 = arith.constant 495 : i32
    %30 = tpu.dynamic_rotate %1 by %c495_i32 dim 1 : vector<4x512xf32>, i32 -> vector<4x512xf32>
    %31 = vector.extract_strided_slice %0 {offsets = [8, 0], sizes = [1, 512], strides = [1, 1]} : vector<9x512xf32> to vector<1x512xf32>
    %32 = vector.broadcast %31 : vector<1x512xf32> to vector<4x512xf32>
    %33 = arith.mulf %30, %32 : vector<4x512xf32>
    %34 = tpu.concatenate %5, %9, %13, %17, %1, %21, %25, %29, %33 in 0 : vector<4x512xf32>, vector<4x512xf32>, vector<4x512xf32>, vector<4x512xf32>, vector<4x512xf32>, vector<4x512xf32>, vector<4x512xf32>, vector<4x512xf32>, vector<4x512xf32> -> vector<36x512xf32>
    %35 = arith.truncf %34 : vector<36x512xf32> to vector<36x512xbf16>
    %c0_3 = arith.constant 0 : index
    %c0_4 = arith.constant 0 : index
    %36 = vector.load %arg2[%c0_3, %c0_4] : memref<8x36xbf16, #tpu.memory_space<vmem>>, vector<8x36xbf16>
    %cst = arith.constant dense<0.000000e+00> : vector<8x512xf32>
    %37 = tpu.matmul %36, %35, %cst {dimension_numbers = #tpu.dot_dimension_numbers<[1], [0], [0], [1], [0, 0, 1, 1], [], []>} : vector<8x36xbf16>, vector<36x512xbf16>, vector<8x512xf32> -> vector<8x512xf32>
    %c0_5 = arith.constant 0 : index
    %c0_6 = arith.constant 0 : index
    %38 = vector.load %arg3[%c0_5, %c0_6] : memref<8x1xf32, #tpu.memory_space<vmem>>, vector<8x1xf32>
    %39 = vector.broadcast %38 : vector<8x1xf32> to vector<8x512xf32>
    %40 = arith.addf %37, %39 : vector<8x512xf32>
    %cst_7 = arith.constant 0.000000e+00 : f32
    %41 = vector.broadcast %cst_7 : f32 to vector<8x512xf32>
    %42 = arith.maximumf %40, %41 : vector<8x512xf32>
    %c17_i32_8 = arith.constant 17 : i32
    %43 = tpu.dynamic_rotate %42 by %c17_i32_8 dim 1 : vector<8x512xf32>, i32 -> vector<8x512xf32>
    %44 = vector.extract_strided_slice %0 {offsets = [0, 0], sizes = [1, 512], strides = [1, 1]} : vector<9x512xf32> to vector<1x512xf32>
    %45 = vector.broadcast %44 : vector<1x512xf32> to vector<8x512xf32>
    %46 = arith.mulf %43, %45 : vector<8x512xf32>
    %c16_i32_9 = arith.constant 16 : i32
    %47 = tpu.dynamic_rotate %42 by %c16_i32_9 dim 1 : vector<8x512xf32>, i32 -> vector<8x512xf32>
    %48 = vector.extract_strided_slice %0 {offsets = [1, 0], sizes = [1, 512], strides = [1, 1]} : vector<9x512xf32> to vector<1x512xf32>
    %49 = vector.broadcast %48 : vector<1x512xf32> to vector<8x512xf32>
    %50 = arith.mulf %47, %49 : vector<8x512xf32>
    %c15_i32_10 = arith.constant 15 : i32
    %51 = tpu.dynamic_rotate %42 by %c15_i32_10 dim 1 : vector<8x512xf32>, i32 -> vector<8x512xf32>
    %52 = vector.extract_strided_slice %0 {offsets = [2, 0], sizes = [1, 512], strides = [1, 1]} : vector<9x512xf32> to vector<1x512xf32>
    %53 = vector.broadcast %52 : vector<1x512xf32> to vector<8x512xf32>
    %54 = arith.mulf %51, %53 : vector<8x512xf32>
    %c1_i32_11 = arith.constant 1 : i32
    %55 = tpu.dynamic_rotate %42 by %c1_i32_11 dim 1 : vector<8x512xf32>, i32 -> vector<8x512xf32>
    %56 = vector.extract_strided_slice %0 {offsets = [3, 0], sizes = [1, 512], strides = [1, 1]} : vector<9x512xf32> to vector<1x512xf32>
    %57 = vector.broadcast %56 : vector<1x512xf32> to vector<8x512xf32>
    %58 = arith.mulf %55, %57 : vector<8x512xf32>
    %c511_i32_12 = arith.constant 511 : i32
    %59 = tpu.dynamic_rotate %42 by %c511_i32_12 dim 1 : vector<8x512xf32>, i32 -> vector<8x512xf32>
    %60 = vector.extract_strided_slice %0 {offsets = [5, 0], sizes = [1, 512], strides = [1, 1]} : vector<9x512xf32> to vector<1x512xf32>
    %61 = vector.broadcast %60 : vector<1x512xf32> to vector<8x512xf32>
    %62 = arith.mulf %59, %61 : vector<8x512xf32>
    %c497_i32_13 = arith.constant 497 : i32
    %63 = tpu.dynamic_rotate %42 by %c497_i32_13 dim 1 : vector<8x512xf32>, i32 -> vector<8x512xf32>
    %64 = vector.extract_strided_slice %0 {offsets = [6, 0], sizes = [1, 512], strides = [1, 1]} : vector<9x512xf32> to vector<1x512xf32>
    %65 = vector.broadcast %64 : vector<1x512xf32> to vector<8x512xf32>
    %66 = arith.mulf %63, %65 : vector<8x512xf32>
    %c496_i32_14 = arith.constant 496 : i32
    %67 = tpu.dynamic_rotate %42 by %c496_i32_14 dim 1 : vector<8x512xf32>, i32 -> vector<8x512xf32>
    %68 = vector.extract_strided_slice %0 {offsets = [7, 0], sizes = [1, 512], strides = [1, 1]} : vector<9x512xf32> to vector<1x512xf32>
    %69 = vector.broadcast %68 : vector<1x512xf32> to vector<8x512xf32>
    %70 = arith.mulf %67, %69 : vector<8x512xf32>
    %c495_i32_15 = arith.constant 495 : i32
    %71 = tpu.dynamic_rotate %42 by %c495_i32_15 dim 1 : vector<8x512xf32>, i32 -> vector<8x512xf32>
    %72 = vector.extract_strided_slice %0 {offsets = [8, 0], sizes = [1, 512], strides = [1, 1]} : vector<9x512xf32> to vector<1x512xf32>
    %73 = vector.broadcast %72 : vector<1x512xf32> to vector<8x512xf32>
    %74 = arith.mulf %71, %73 : vector<8x512xf32>
    %75 = tpu.concatenate %46, %50, %54, %58, %42, %62, %66, %70, %74 in 0 : vector<8x512xf32>, vector<8x512xf32>, vector<8x512xf32>, vector<8x512xf32>, vector<8x512xf32>, vector<8x512xf32>, vector<8x512xf32>, vector<8x512xf32>, vector<8x512xf32> -> vector<72x512xf32>
    %76 = arith.truncf %75 : vector<72x512xf32> to vector<72x512xbf16>
    %c0_16 = arith.constant 0 : index
    %c0_17 = arith.constant 0 : index
    %77 = vector.load %arg4[%c0_16, %c0_17] : memref<16x72xbf16, #tpu.memory_space<vmem>>, vector<16x72xbf16>
    %cst_18 = arith.constant dense<0.000000e+00> : vector<16x512xf32>
    %78 = tpu.matmul %77, %76, %cst_18 {dimension_numbers = #tpu.dot_dimension_numbers<[1], [0], [0], [1], [0, 0, 1, 1], [], []>} : vector<16x72xbf16>, vector<72x512xbf16>, vector<16x512xf32> -> vector<16x512xf32>
    %c0_19 = arith.constant 0 : index
    %c0_20 = arith.constant 0 : index
    %79 = vector.load %arg5[%c0_19, %c0_20] : memref<16x1xf32, #tpu.memory_space<vmem>>, vector<16x1xf32>
    %80 = vector.broadcast %79 : vector<16x1xf32> to vector<16x512xf32>
    %81 = arith.addf %78, %80 : vector<16x512xf32>
    %cst_21 = arith.constant 0.000000e+00 : f32
    %82 = vector.broadcast %cst_21 : f32 to vector<16x512xf32>
    %83 = arith.maximumf %81, %82 : vector<16x512xf32>
    %c0_22 = arith.constant 0 : index
    %c0_23 = arith.constant 0 : index
    %84 = vector.load %arg6[%c0_22, %c0_23] : memref<16x512xf32, #tpu.memory_space<vmem>>, vector<16x512xf32>
    tpu.vector_store %arg6[%c0_22, %c0_23], %83 {strides = array<i32>} : memref<16x512xf32, #tpu.memory_space<vmem>>, vector<16x512xf32>,
    return
  }
}

</mosaic_0001>

<bundles_post_ra>
// kernel: image_model_forward.1
= control target key start
LH: loop header
LB: loop body
LE: loop exit
PB: predicated region body
PF: predicated region fallthrough
CT: control target
= control target key end

     0   :  { %s809_s25 = smov 16   ;;  %s811_s26 = smov 17   ;;  %v816_v4 = vmov 0   ;;  %v48_v8 = vlaneseq  ;;  %vm354_vm3 = vcmask 1043456   ;;  %vm394_vm9 = vcmask 1041408   ;;  %s1415_s0 = inlined_call_operand.vmem [shape: f32[4,512], index: 0, kind: input, shape index: {}]   ;;  %s1416_s3 = inlined_call_operand.vmem [shape: f32[8,1], index: 3, kind: input, shape index: {}]   ;;  %s1417_s1 = inlined_call_operand.vmem [shape: f32[9,512], index: 1, kind: input, shape index: {}]   ;;  %s1418_s2 = inlined_call_operand.vmem [shape: bf16[8,36], index: 2, kind: input, shape index: {}]   ;;  %s1419_s4 = inlined_call_operand.vmem [shape: bf16[16,72], index: 4, kind: input, shape index: {}]   ;;  %s1420_s5 = inlined_call_operand.vmem [shape: f32[16,1], index: 5, kind: input, shape index: {}]   ;;  %s1421_s6 = inlined_call_operand.vmem [shape: f32[16,512], index: 6, kind: output, shape index: {}]  }
   0x1   :  { %v856_v0 = vld [vmem:[%s1415_s0 + $0x8] sm:$0xff]  ;;  %v861_v1 = vld [vmem:[%s1415_s0] sm:$0xff]  ;;  %s810_s0 = smov 1   ;;  %s812_s27 = smov 15   ;;  %439 = vmatprep.mubr.bf16.mxu0 %v816_v4  ;;  %480 = vmatprep.mubr.bf16.mxu1 %v816_v4  ;;  %v955_v17 = vld [vmem:[%s1417_s1 + $0x18] sm:$0xff]  ;;  %vm390_vm10 = vcmask 293888  }
   0x2   :  { %79 = vrot.lane.b32.xlu1 %v856_v0, %s809_s25  ;;  %75 = vrot.lane.b32.xlu0 %v861_v1, %s809_s25  ;;  %v869_v2 = vcombine.high %v856_v0, %v856_v0  ;;  %v873_v3 = vcombine.high %v861_v1, %v861_v1  ;;  %s813_s28 = smov 127   ;;  %s814_s29 = smov 112   ;;  %v384_v5 = vld [vmem:[%s1416_s3] sm:$0xff]  ;;  %v942_v11 = vshrl.u32 %v48_v8, 7  ;;  %v944_v14 = vand.u32 127, %v48_v8  ;;  %v961_v21 = vld [vmem:[%s1417_s1 + $0x8] sm:$0xff] }
   0x3   :  { %s815_s30 = smov 113   ;;  %804 = vset.pattern.permute.xlu0 %v816_v4  ;;  %805 = vset.pattern.permute.xlu1 %v816_v4  ;;  %s817_s7 = smov 111   ;;  %v950_v16 = vld [vmem:[%s1417_s1] sm:$0xff]  ;;  %v966_v22 = vld [vmem:[%s1417_s1 + $0x10] sm:$0xff]  ;;  %vm660_vm11 = vcmask 588800  }
   0x4   :  { %v90_v15 = vsub.s32 1, %v942_v11  ;;  %v156_v18 = vsub.s32 3, %v942_v11  ;;  %v57_v23 = vsub.s32 0, %v942_v11  ;;  %vm83_vm0 = vcmp.lt.s32.totalorder %v944_v14, 16 }
   0x5   :  { %vm149_vm1 = vcmp.lt.s32.totalorder %v944_v14, 1  ;;  %vm50_vm2 = vcmp.lt.s32.totalorder %v944_v14, 17  ;;  %v123_v31 = vsub.s32 2, %v942_v11  ;;  %vm116_vm4 = vcmp.lt.s32.totalorder %v944_v14, 15 }
   0x6   :  { %81 = vrot.lane.b32.xlu1 %v869_v2, %s809_s25  ;;  %77 = vrot.lane.b32.xlu0 %v873_v3, %s809_s25  ;;  %v971_v24 = vrot.slane %v950_v16, %v90_v15  ;;  %v974_v25 = vrot.slane %v955_v17, %v90_v15  ;;  %v979_v26 = vrot.slane %v961_v21, %v90_v15  ;;  %vm182_vm5 = vcmp.lt.s32.totalorder %v944_v14, 127 }
   0x7   :  { %v982_v27 = vrot.slane %v966_v22, %v90_v15  ;;  %v985_v28 = vrot.slane %v961_v21, %v156_v18  ;;  %v989_v32 = vrot.slane %v950_v16, %v156_v18  ;;  %v992_v33 = vrot.slane %v966_v22, %v156_v18 }
   0x8   :  { %v995_v34 = vrot.slane %v955_v17, %v156_v18  ;;  %v998_v35 = vrot.slane %v961_v21, %v57_v23  ;;  %v1005_v38 = vrot.slane %v950_v16, %v57_v23  ;;  %v1008_v39 = vrot.slane %v966_v22, %v57_v23 }
   0x9   :  { %v1015_v42 = vrot.slane %v955_v17, %v57_v23  ;;  %v1023_v47 = vrot.slane %v961_v21, %v123_v31  ;;  %v1034_v54 = vrot.slane %v950_v16, %v123_v31  ;;  %v1037_v55 = vrot.slane %v966_v22, %v123_v31 }
   0xa   :  { %143 = vrot.lane.b32.xlu1 %v873_v3, %s810_s0  ;;  %141 = vrot.lane.b32.xlu0 %v861_v1, %s810_s0  ;;  %v1044_v59 = vrot.slane %v955_v17, %v123_v31  ;;  %vm248_vm6 = vcmp.lt.s32.totalorder %v944_v14, 112  ;;  %vm215_vm7 = vcmp.lt.s32.totalorder %v944_v14, 113  ;;  %vm281_vm8 = vcmp.lt.s32.totalorder %v944_v14, 111 }
   0xe   :  { %147 = vrot.lane.b32.xlu1 %v869_v2, %s810_s0  ;;  %145 = vrot.lane.b32.xlu0 %v856_v0, %s810_s0 }
  0x12   :  { %42 = vrot.lane.b32.xlu1 %v873_v3, %s811_s26  ;;  %40 = vrot.lane.b32.xlu0 %v861_v1, %s811_s26 }
  0x16   :  { %46 = vrot.lane.b32.xlu1 %v869_v2, %s811_s26  ;;  %44 = vrot.lane.b32.xlu0 %v856_v0, %s811_s26 }
  0x1a   :  { %110 = vrot.lane.b32.xlu1 %v873_v3, %s812_s27  ;;  %108 = vrot.lane.b32.xlu0 %v861_v1, %s812_s27 }
  0x1e   :  { %114 = vrot.lane.b32.xlu1 %v869_v2, %s812_s27  ;;  %112 = vrot.lane.b32.xlu0 %v856_v0, %s812_s27 }
  0x22   :  { %176 = vrot.lane.b32.xlu1 %v873_v3, %s813_s28  ;;  %174 = vrot.lane.b32.xlu0 %v861_v1, %s813_s28 }
  0x26   :  { %180 = vrot.lane.b32.xlu1 %v869_v2, %s813_s28  ;;  %178 = vrot.lane.b32.xlu0 %v856_v0, %s813_s28 }
  0x2a   :  { %242 = vrot.lane.b32.xlu1 %v873_v3, %s814_s29  ;;  %240 = vrot.lane.b32.xlu0 %v861_v1, %s814_s29 }
  0x2e   :  { %246 = vrot.lane.b32.xlu1 %v869_v2, %s814_s29  ;;  %244 = vrot.lane.b32.xlu0 %v856_v0, %s814_s29 }
  0x32   :  { %209 = vrot.lane.b32.xlu1 %v873_v3, %s815_s30  ;;  %207 = vrot.lane.b32.xlu0 %v861_v1, %s815_s30 }
  0x36   :  { %213 = vrot.lane.b32.xlu1 %v869_v2, %s815_s30  ;;  %211 = vrot.lane.b32.xlu0 %v856_v0, %s815_s30 }
  0x3a   :  { %275 = vrot.lane.b32.xlu1 %v873_v3, %s817_s7  ;;  %273 = vrot.lane.b32.xlu0 %v861_v1, %s817_s7 }
  0x3e   :  { %279 = vrot.lane.b32.xlu1 %v869_v2, %s817_s7  ;;  %277 = vrot.lane.b32.xlu0 %v856_v0, %s817_s7 }
  0x42   :  { %387 = vperm.xlu0 %804, %v384_v5  }
  0x74   :  { %v80_v6 = vpop.permute.xlu1 %79  ;;  %v76_v7 = vpop.permute.xlu0 %75 }
  0x78   :  { %v82_v9 = vpop.permute.xlu1 %81  ;;  %v78_v10 = vpop.permute.xlu0 %77 }
  0x79   :  { %v84_v36 = vsel %vm83_vm0, %v80_v6, %v82_v9  ;;  %v87_v37 = vsel %vm83_vm0, %v82_v9, %v76_v7  ;;  %v86_v40 = vsel %vm83_vm0, %v76_v7, %v78_v10  ;;  %v85_v43 = vsel %vm83_vm0, %v78_v10, %v80_v6 }
  0x7a   :  { %v104_v48 = vmul.f32 %v971_v24, %v87_v37  ;;  %v107_v49 = vmul.f32 %v974_v25, %v84_v36  ;;  %v105_v52 = vmul.f32 %v979_v26, %v86_v40  ;;  %v106_v56 = vmul.f32 %v982_v27, %v85_v43 }
  0x7c   :  { %v144_v12 = vpop.permute.xlu1 %143  ;;  %v142_v13 = vpop.permute.xlu0 %141  ;;  %v310_v7 = vrot.slane %v104_v48, 4  ;;  %v313_v8 = vrot.slane %v107_v49, 4 }
  0x7d   :  { %v152_v41 = vsel %vm149_vm1, %v142_v13, %v144_v12 }
  0x7e   :  { %v171_v53 = vmul.f32 %v985_v28, %v152_v41 }
  0x80   :  { %v148_v19 = vpop.permute.xlu1 %147  ;;  %v146_v20 = vpop.permute.xlu0 %145 }
  0x81   :  { %v153_v44 = vsel %vm149_vm1, %v148_v19, %v142_v13  ;;  %v151_v50 = vsel %vm149_vm1, %v144_v12, %v146_v20  ;;  %v150_v58 = vsel %vm149_vm1, %v146_v20, %v148_v19  ;;  %v311_v12 = vrot.slane %v105_v52, 4 }
  0x82   :  { %v170_v57 = vmul.f32 %v989_v32, %v153_v44  ;;  %v172_v60 = vmul.f32 %v992_v33, %v151_v50  ;;  %v323_v13 = vrot.slane %v171_v53, 4  ;;  %v173_v15 = vmul.f32 %v995_v34, %v150_v58 }
  0x83   :  { %v312_v19 = vrot.slane %v106_v56, 4 }
  0x84   :  { %v43_v29 = vpop.permute.xlu1 %42  ;;  %v41_v30 = vpop.permute.xlu0 %40  ;;  %v322_v20 = vrot.slane %v170_v57, 4  ;;  %v324_v31 = vrot.slane %v172_v60, 4  ;;  %v325_v48 = vrot.slane %v173_v15, 4 }
  0x85   :  { %v53_v51 = vsel %vm50_vm2, %v41_v30, %v43_v29 }
  0x86   :  { %v72_v61 = vmul.f32 %v998_v35, %v53_v51 }
  0x88   :  { %v47_v45 = vpop.permute.xlu1 %46  ;;  %v45_v46 = vpop.permute.xlu0 %44  ;;  %v356_v40 = vsel %vm354_vm3, %v72_v61, %v311_v12 }
  0x89   :  { %v54_v62 = vsel %vm50_vm2, %v47_v45, %v41_v30  ;;  %v51_v63 = vsel %vm50_vm2, %v45_v46, %v47_v45  ;;  %v52_v9 = vsel %vm50_vm2, %v43_v29, %v45_v46 }
  0x8a   :  { %v71_v23 = vmul.f32 %v1005_v38, %v54_v62  ;;  %v74_v30 = vmul.f32 %v1015_v42, %v51_v63  ;;  %v73_v36 = vmul.f32 %v1008_v39, %v52_v9 }
  0x8c   :  { %v111_v5 = vpop.permute.xlu1 %110  ;;  %v109_v6 = vpop.permute.xlu0 %108  ;;  %v355_v52 = vsel %vm354_vm3, %v71_v23, %v310_v7  ;;  %v358_v53 = vsel %vm354_vm3, %v74_v30, %v313_v8  ;;  %v357_v61 = vsel %vm354_vm3, %v73_v36, %v312_v19  ;;  %v189_v8 = vsub.s32 5, %v942_v11 }
  0x8d   :  { %v119_v10 = vsel %vm116_vm4, %v109_v6, %v111_v5 }
  0x8e   :  { %v138_v18 = vmul.f32 %v1023_v47, %v119_v10  ;;  %v255_v10 = vsub.s32 7, %v942_v11  ;;  %v1082_v15 = vrot.slane %v950_v16, %v189_v8  ;;  %v1087_v19 = vrot.slane %v955_v17, %v189_v8 }
  0x8f   :  { %v1093_v23 = vrot.slane %v966_v22, %v189_v8 }
  0x90   :  { %v115_v37 = vpop.permute.xlu1 %114  ;;  %v113_v29 = vpop.permute.xlu0 %112  ;;  %v360_v41 = vsel %vm354_vm3, %v138_v18, %v323_v13  ;;  %v222_v18 = vsub.s32 6, %v942_v11  ;;  %v1096_v30 = vrot.slane %v950_v16, %v255_v10 }
  0x91   :  { %v120_v43 = vsel %vm116_vm4, %v115_v37, %v109_v6  ;;  %v117_v44 = vsel %vm116_vm4, %v113_v29, %v115_v37  ;;  %v118_v45 = vsel %vm116_vm4, %v111_v5, %v113_v29  ;;  %v372_v46 = vpack.c.bf16 %v360_v41, %v356_v40 }
  0x92   :  { %v137_v49 = vmul.f32 %v1034_v54, %v120_v43  ;;  %v139_v50 = vmul.f32 %v1037_v55, %v118_v45  ;;  %v140_v51 = vmul.f32 %v1044_v59, %v117_v44  ;;  %v1105_v37 = vrot.slane %v955_v17, %v255_v10 }
  0x93   :  { %407 = vmatprep.subr.bf16.mxu0 %v372_v46  ;;  %v1114_v45 = vrot.slane %v961_v21, %v255_v10  ;;  %v1117_v46 = vrot.slane %v966_v22, %v255_v10 }
  0x94   :  { %v177_v56 = vpop.permute.xlu1 %176  ;;  %v175_v57 = vpop.permute.xlu0 %174  ;;  %v359_v58 = vsel %vm354_vm3, %v137_v49, %v322_v20  ;;  %v362_v60 = vsel %vm354_vm3, %v140_v51, %v325_v48  ;;  %v361_v62 = vsel %vm354_vm3, %v139_v50, %v324_v31  ;;  %v1090_v20 = vrot.slane %v961_v21, %v189_v8 }
  0x95   :  { %v371_v63 = vpack.c.bf16 %v359_v58, %v355_v52  ;;  %v374_v5 = vpack.c.bf16 %v362_v60, %v358_v53  ;;  %v373_v6 = vpack.c.bf16 %v361_v62, %v357_v61  ;;  %v185_v31 = vsel %vm182_vm5, %v175_v57, %v177_v56 }
  0x96   :  { %v1123_v49 = vrot.slane %v950_v16, %v222_v18  ;;  %v203_v50 = vmul.f32 %v1082_v15, %v185_v31 }
  0x97   :  { %408 = vmatpush1.bf16.msra.mxu0 %v371_v63  ;;  %448 = vmatprep.subr.bf16.mxu1 %v374_v5  ;;  %v1138_v5 = vrot.slane %v955_v17, %v222_v18 }
  0x98   :  { %v181_v9 = vpop.permute.xlu1 %180  ;;  %449 = vmatpush1.bf16.msra.mxu1 %v373_v6  ;;  %v179_v7 = vpop.permute.xlu0 %178  ;;  %v1141_v6 = vrot.slane %v961_v21, %v222_v18 }
  0x99   :  { %v186_v36 = vsel %vm182_vm5, %v181_v9, %v175_v57  ;;  %v184_v11 = vsel %vm182_vm5, %v177_v56, %v179_v7  ;;  %v183_v41 = vsel %vm182_vm5, %v179_v7, %v181_v9  ;;  %v1144_v9 = vrot.slane %v966_v22, %v222_v18 }
  0x9a   :  { %v206_v51 = vmul.f32 %v1087_v19, %v186_v36  ;;  %v204_v52 = vmul.f32 %v1090_v20, %v184_v11  ;;  %v205_v56 = vmul.f32 %v1093_v23, %v183_v41  ;;  %v334_v7 = vrot.slane %v203_v50, 4 }
  0x9c   :  { %v243_v12 = vpop.permute.xlu1 %242  ;;  %v241_v13 = vpop.permute.xlu0 %240  ;;  %v337_v8 = vrot.slane %v206_v51, 4  ;;  %v335_v10 = vrot.slane %v204_v52, 4  ;;  %v363_v52 = vsel %vm354_vm3, %v861_v1, %v334_v7 }
  0x9d   :  { %v251_v43 = vsel %vm248_vm6, %v241_v13, %v243_v12 }
  0x9e   :  { %v269_v57 = vmul.f32 %v1096_v30, %v251_v43  ;;  %v364_v50 = vsel %vm354_vm3, %v873_v3, %v335_v10  ;;  %v366_v51 = vsel %vm354_vm3, %v869_v2, %v337_v8  ;;  %v1180_v8 = vld [vmem:[%s1417_s1 + $0x38] ss:$0 sm:$0xff]  ;;  %v1190_v10 = vld [vmem:[%s1417_s1 + $0x30] ss:$0 sm:$0xff] }
  0xa0   :  { %v247_v29 = vpop.permute.xlu1 %246  ;;  %v245_v40 = vpop.permute.xlu0 %244  ;;  %v346_v31 = vrot.slane %v269_v57, 4 }
  0xa1   :  { %v252_v44 = vsel %vm248_vm6, %v247_v29, %v241_v13  ;;  %v250_v48 = vsel %vm248_vm6, %v243_v12, %v245_v40  ;;  %v249_v53 = vsel %vm248_vm6, %v245_v40, %v247_v29  ;;  %v336_v13 = vrot.slane %v205_v56, 4 }
  0xa2   :  { %v272_v58 = vmul.f32 %v1105_v37, %v252_v44  ;;  %v270_v16 = vmul.f32 %v1114_v45, %v250_v48  ;;  %v271_v63 = vmul.f32 %v1117_v46, %v249_v53  ;;  %v1160_v48 = vld [vmem:[%s1417_s1 + $0x20] ss:$0 sm:$0xff] }
  0xa4   :  { %v210_v60 = vpop.permute.xlu1 %209  ;;  %v208_v61 = vpop.permute.xlu0 %207  ;;  %v349_v36 = vrot.slane %v272_v58, 4  ;;  %v347_v17 = vrot.slane %v270_v16, 4  ;;  %v348_v40 = vrot.slane %v271_v63, 4 }
  0xa5   :  { %v218_v62 = vsel %vm215_vm7, %v208_v61, %v210_v60 }
  0xa6   :  { %v236_v12 = vmul.f32 %v1123_v49, %v218_v62 }
  0xa8   :  { %v214_v11 = vpop.permute.xlu1 %213  ;;  %v212_v29 = vpop.permute.xlu0 %211  ;;  %v367_v53 = vsel %vm354_vm3, %v236_v12, %v346_v31 }
  0xa9   :  { %v219_v21 = vsel %vm215_vm7, %v214_v11, %v208_v61  ;;  %v216_v22 = vsel %vm215_vm7, %v212_v29, %v214_v11  ;;  %v217_v18 = vsel %vm215_vm7, %v210_v60, %v212_v29  ;;  %v365_v61 = vsel %vm354_vm3, %v856_v0, %v336_v13  ;;  %v1185_v0 = vld [vmem:[%s1417_s1 + $0x28] ss:$0 sm:$0xff] }
  0xaa   :  { %v239_v41 = vmul.f32 %v1138_v5, %v219_v21  ;;  %v237_v43 = vmul.f32 %v1141_v6, %v217_v18  ;;  %v238_v44 = vmul.f32 %v1144_v9, %v216_v22  ;;  %v375_v7 = vpack.c.bf16 %v367_v53, %v363_v52 }
  0xac   :  { %v276_v56 = vpop.permute.xlu1 %275  ;;  %v274_v57 = vpop.permute.xlu0 %273  ;;  %v368_v58 = vsel %vm354_vm3, %v237_v43, %v347_v17  ;;  %v370_v60 = vsel %vm354_vm3, %v239_v41, %v349_v36  ;;  %v369_v16 = vsel %vm354_vm3, %v238_v44, %v348_v40 }
  0xad   :  { %v284_v3 = vsel %vm281_vm8, %v274_v57, %v276_v56  ;;  %v376_v2 = vpack.c.bf16 %v368_v58, %v364_v50  ;;  %v378_v62 = vpack.c.bf16 %v370_v60, %v366_v51  ;;  %v377_v63 = vpack.c.bf16 %v369_v16, %v365_v61  ;;  %v383_v50 = vld [vmem:[%s1418_s2] sm:$0xf] }
  0xae   :  { %v302_v1 = vmul.f32 %v1160_v48, %v284_v3 }
  0xaf   :  { %409 = vmatprep.subr.bf16.mxu0 %v376_v2  ;;  %450 = vmatprep.subr.bf16.mxu1 %v378_v62 }
  0xb0   :  { %v280_v12 = vpop.permute.xlu1 %279  ;;  %410 = vmatpush1.bf16.msra.mxu0 %v375_v7  ;;  %451 = vmatpush1.bf16.msra.mxu1 %v377_v63  ;;  %v278_v13 = vpop.permute.xlu0 %277  ;;  %v379_v29 = vpack.c.bf16 %v302_v1, %v302_v1 }
  0xb1   :  { %v285_v31 = vsel %vm281_vm8, %v280_v12, %v274_v57  ;;  %v282_v36 = vsel %vm281_vm8, %v278_v13, %v280_v12  ;;  %v283_v11 = vsel %vm281_vm8, %v276_v56, %v278_v13  ;;  %v643_v13 = vld [vmem:[%s1420_s5] sm:$0xff] }
  0xb2   :  { %v305_v17 = vmul.f32 %v1180_v8, %v285_v31  ;;  %v303_v21 = vmul.f32 %v1185_v0, %v283_v11  ;;  %v304_v22 = vmul.f32 %v1190_v10, %v282_v36  ;;  %v396_v43 = vsel %vm394_vm9, %v379_v29, 0  ;;  %v644_v31 = vld [vmem:[%s1420_s5 + $0x8] sm:$0xff] }
  0xb4   :  { %v382_v18 = vpack.c.bf16 %v305_v17, %v305_v17  ;;  %v380_v40 = vpack.c.bf16 %v303_v21, %v303_v21  ;;  %v381_v41 = vpack.c.bf16 %v304_v22, %v304_v22 }
  0xb6   :  { %786 = vmatprep.subr.msk.bf16.mxu0 %vm394_vm9, %v380_v40  ;;  %788 = vmatprep.subr.msk.bf16.mxu1 %vm394_vm9, %v382_v18  ;;  %v402_v44 = vsel %vm394_vm9, %v381_v41, 0 }
  0xb7   :  { %412 = vmatpush1.bf16.msra.mxu0 %v396_v43  ;;  %453 = vmatpush1.bf16.msra.mxu1 %v402_v44 }
  0xba   :  { %787 = vmatmul.mubr.msk.bf16.vlgmr.msra.gmra.mrb[0].mxu0 %vm390_vm10, %v383_v50  ;;  %789 = vmatmul.mubr.msk.bf16.vlgmr.msra.gmra.mrb[0].mxu1 %vm390_vm10, %v383_v50 }
  0xbb   :  { %708 = vmatprep.mubr.bf16.mxu0 %v816_v4  ;;  %751 = vmatprep.mubr.bf16.mxu1 %v816_v4 }
  0xc1   :  { %v388_v51 = vpop.permute.xlu0 %387 }
 0x18d   :  { %v441_v52 = vpop.f32.mrb[0].mxu0  ;;  %v482_v53 = vpop.f32.mrb[0].mxu1 }
 0x18e   :  { %v442_v56 = vadd.f32 %v441_v52, %v388_v51  ;;  %v483_v57 = vadd.f32 %v482_v53, %v388_v51  ;;  %v443_v58 = vpop.f32.mrb[1].mxu0  ;;  %v484_v60 = vpop.f32.mrb[1].mxu1 }
 0x18f   :  { %v445_v61 = vpop.f32.mrb[2].mxu0  ;;  %v486_v16 = vpop.f32.mrb[2].mxu1  ;;  %v444_v62 = vadd.f32 %v443_v58, %v388_v51  ;;  %v485_v7 = vadd.f32 %v484_v60, %v388_v51 }
 0x190   :  { %v1206_v3 = vmax.f32 %v442_v56, 0.0  ;;  %v1208_v2 = vmax.f32 %v483_v57, 0.0  ;;  %v446_v63 = vpop.f32.mrb[3].mxu0  ;;  %v487_v1 = vpop.f32.mrb[3].mxu1 }
 0x191   :  { %v1214_v4 = vmax.f32 %v444_v62, 0.0  ;;  %v1220_v12 = vmax.f32 %v485_v7, 0.0 }
 0x192   :  { %497 = vrot.lane.b32.xlu0 %v1208_v2, %s811_s26  ;;  %493 = vrot.lane.b32.xlu1 %v1206_v3, %s811_s26 }
 0x196   :  { %509 = vrot.lane.b32.xlu0 %v1206_v3, %s809_s25  ;;  %495 = vrot.lane.b32.xlu1 %v1214_v4, %s811_s26 }
 0x19a   :  { %513 = vrot.lane.b32.xlu0 %v1208_v2, %s809_s25  ;;  %499 = vrot.lane.b32.xlu1 %v1220_v12, %s811_s26 }
 0x19e   :  { %525 = vrot.lane.b32.xlu0 %v1206_v3, %s812_s27  ;;  %511 = vrot.lane.b32.xlu1 %v1214_v4, %s809_s25 }
 0x1a2   :  { %529 = vrot.lane.b32.xlu0 %v1208_v2, %s812_s27  ;;  %515 = vrot.lane.b32.xlu1 %v1220_v12, %s809_s25 }
 0x1a6   :  { %541 = vrot.lane.b32.xlu0 %v1206_v3, %s810_s0  ;;  %527 = vrot.lane.b32.xlu1 %v1214_v4, %s812_s27 }
 0x1aa   :  { %545 = vrot.lane.b32.xlu0 %v1208_v2, %s810_s0  ;;  %531 = vrot.lane.b32.xlu1 %v1220_v12, %s812_s27 }
 0x1ae   :  { %557 = vrot.lane.b32.xlu0 %v1206_v3, %s813_s28  ;;  %543 = vrot.lane.b32.xlu1 %v1214_v4, %s810_s0 }
 0x1b2   :  { %561 = vrot.lane.b32.xlu0 %v1208_v2, %s813_s28  ;;  %547 = vrot.lane.b32.xlu1 %v1220_v12, %s810_s0 }
 0x1b6   :  { %573 = vrot.lane.b32.xlu0 %v1206_v3, %s815_s30  ;;  %559 = vrot.lane.b32.xlu1 %v1214_v4, %s813_s28 }
 0x1ba   :  { %577 = vrot.lane.b32.xlu0 %v1208_v2, %s815_s30  ;;  %563 = vrot.lane.b32.xlu1 %v1220_v12, %s813_s28 }
 0x1be   :  { %589 = vrot.lane.b32.xlu0 %v1206_v3, %s814_s29  ;;  %575 = vrot.lane.b32.xlu1 %v1214_v4, %s815_s30 }
 0x1c2   :  { %593 = vrot.lane.b32.xlu0 %v1208_v2, %s814_s29  ;;  %579 = vrot.lane.b32.xlu1 %v1220_v12, %s815_s30 }
 0x1c6   :  { %605 = vrot.lane.b32.xlu0 %v1206_v3, %s817_s7  ;;  %591 = vrot.lane.b32.xlu1 %v1214_v4, %s814_s29 }
 0x1ca   :  { %609 = vrot.lane.b32.xlu0 %v1208_v2, %s817_s7  ;;  %595 = vrot.lane.b32.xlu1 %v1220_v12, %s814_s29 }
 0x1ce   :  { %647 = vperm.xlu0 %804, %v643_v13   ;;  %607 = vrot.lane.b32.xlu1 %v1214_v4, %s817_s7 }
 0x1d2   :  { %611 = vrot.lane.b32.xlu1 %v1220_v12, %s817_s7 }
 0x1d6   :  { %652 = vperm.xlu1 %805, %v644_v31  }
 0x204   :  { %v498_v36 = vpop.permute.xlu0 %497  ;;  %v494_v11 = vpop.permute.xlu1 %493 }
 0x208   :  { %v510_v29 = vpop.permute.xlu0 %509  ;;  %v496_v17 = vpop.permute.xlu1 %495 }
 0x209   :  { %v503_v18 = vsel %vm50_vm2, %v494_v11, %v496_v17  ;;  %v502_v56 = vsel %vm50_vm2, %v496_v17, %v498_v36 }
 0x20a   :  { %v506_v44 = vmul.f32 %v503_v18, %v998_v35  ;;  %v507_v7 = vmul.f32 %v502_v56, %v1008_v39 }
 0x20c   :  { %v514_v21 = vpop.permute.xlu0 %513  ;;  %v500_v22 = vpop.permute.xlu1 %499 }
 0x20d   :  { %v501_v52 = vsel %vm50_vm2, %v498_v36, %v500_v22  ;;  %v504_v53 = vsel %vm50_vm2, %v500_v22, %v494_v11 }
 0x20e   :  { %v505_v16 = vmul.f32 %v504_v53, %v1005_v38  ;;  %v508_v62 = vmul.f32 %v501_v52, %v1015_v42 }
 0x210   :  { %v526_v40 = vpop.permute.xlu0 %525  ;;  %v512_v41 = vpop.permute.xlu1 %511 }
 0x211   :  { %v519_v43 = vsel %vm83_vm0, %v510_v29, %v512_v41  ;;  %v518_v50 = vsel %vm83_vm0, %v512_v41, %v514_v21 }
 0x212   :  { %v522_v51 = vmul.f32 %v519_v43, %v979_v26  ;;  %v523_v61 = vmul.f32 %v518_v50, %v982_v27 }
 0x214   :  { %v530_v57 = vpop.permute.xlu0 %529  ;;  %v516_v58 = vpop.permute.xlu1 %515  ;;  %v622_v60 = vpack.c.bf16 %v522_v51, %v506_v44  ;;  %v623_v11 = vpack.c.bf16 %v523_v61, %v507_v7 }
 0x215   :  { %v517_v35 = vsel %vm83_vm0, %v514_v21, %v516_v58  ;;  %v520_v26 = vsel %vm83_vm0, %v516_v58, %v510_v29 }
 0x216   :  { %v521_v63 = vmul.f32 %v520_v26, %v971_v24  ;;  %v524_v1 = vmul.f32 %v517_v35, %v974_v25  ;;  %676 = vmatprep.subr.bf16.mxu0 %v622_v60 }
 0x218   :  { %v621_v13 = vpack.c.bf16 %v521_v63, %v505_v16  ;;  %v542_v31 = vpop.permute.xlu0 %541  ;;  %v528_v27 = vpop.permute.xlu1 %527  ;;  %v624_v36 = vpack.c.bf16 %v524_v1, %v508_v62 }
 0x219   :  { %v535_v38 = vsel %vm116_vm4, %v526_v40, %v528_v27  ;;  %v534_v43 = vsel %vm116_vm4, %v528_v27, %v530_v57 }
 0x21a   :  { %677 = vmatpush1.bf16.msra.mxu0 %v621_v13  ;;  %719 = vmatprep.subr.bf16.mxu1 %v624_v36  ;;  %v538_v39 = vmul.f32 %v535_v38, %v1023_v47 }
 0x21b   :  { %720 = vmatpush1.bf16.msra.mxu1 %v623_v11 }
 0x21c   :  { %v546_v29 = vpop.permute.xlu0 %545  ;;  %v532_v17 = vpop.permute.xlu1 %531 }
 0x21d   :  { %v533_v18 = vsel %vm116_vm4, %v530_v57, %v532_v17  ;;  %v536_v41 = vsel %vm116_vm4, %v532_v17, %v526_v40  ;;  %v539_v57 = vmul.f32 %v534_v43, %v1037_v55 }
 0x21e   :  { %v537_v53 = vmul.f32 %v536_v41, %v1034_v54  ;;  %v540_v56 = vmul.f32 %v533_v18, %v1044_v59 }
 0x220   :  { %v558_v42 = vpop.permute.xlu0 %557  ;;  %v544_v24 = vpop.permute.xlu1 %543 }
 0x221   :  { %v551_v25 = vsel %vm149_vm1, %v542_v31, %v544_v24  ;;  %v550_v21 = vsel %vm149_vm1, %v544_v24, %v546_v29 }
 0x222   :  { %v554_v22 = vmul.f32 %v551_v25, %v985_v28  ;;  %v555_v52 = vmul.f32 %v550_v21, %v992_v33 }
 0x224   :  { %v562_v44 = vpop.permute.xlu0 %561  ;;  %v548_v50 = vpop.permute.xlu1 %547  ;;  %v626_v51 = vpack.c.bf16 %v554_v22, %v538_v39  ;;  %v627_v26 = vpack.c.bf16 %v555_v52, %v539_v57 }
 0x225   :  { %v549_v47 = vsel %vm149_vm1, %v546_v29, %v548_v50  ;;  %v552_v28 = vsel %vm149_vm1, %v548_v50, %v542_v31 }
 0x226   :  { %v553_v40 = vmul.f32 %v552_v28, %v989_v32  ;;  %v556_v58 = vmul.f32 %v549_v47, %v995_v34  ;;  %678 = vmatprep.subr.bf16.mxu0 %v626_v51 }
 0x228   :  { %v625_v60 = vpack.c.bf16 %v553_v40, %v537_v53  ;;  %v574_v61 = vpop.permute.xlu0 %573  ;;  %v560_v33 = vpop.permute.xlu1 %559  ;;  %v628_v35 = vpack.c.bf16 %v556_v58, %v540_v56 }
 0x229   :  { %v566_v16 = vsel %vm182_vm5, %v560_v33, %v562_v44  ;;  %v567_v54 = vsel %vm182_vm5, %v558_v42, %v560_v33 }
 0x22a   :  { %v569_v59 = vmul.f32 %v567_v54, %v1082_v15  ;;  %v570_v32 = vmul.f32 %v566_v16, %v1090_v20  ;;  %679 = vmatpush1.bf16.msra.mxu0 %v625_v60  ;;  %721 = vmatprep.subr.bf16.mxu1 %v628_v35 }
 0x22b   :  { %722 = vmatpush1.bf16.msra.mxu1 %v627_v26 }
 0x22c   :  { %v629_v34 = vpack.c.bf16 %v569_v59, %v1206_v3  ;;  %v578_v55 = vpop.permute.xlu0 %577  ;;  %v564_v62 = vpop.permute.xlu1 %563  ;;  %v630_v63 = vpack.c.bf16 %v570_v32, %v1214_v4 }
 0x22d   :  { %v565_v1 = vsel %vm182_vm5, %v562_v44, %v564_v62  ;;  %v568_v7 = vsel %vm182_vm5, %v564_v62, %v558_v42 }
 0x22e   :  { %v571_v13 = vmul.f32 %v565_v1, %v1093_v23  ;;  %v572_v15 = vmul.f32 %v568_v7, %v1087_v19  ;;  %680 = vmatprep.subr.bf16.mxu0 %v630_v63 }
 0x22f   :  { %681 = vmatpush1.bf16.msra.mxu0 %v629_v34 }
 0x230   :  { %v631_v20 = vpack.c.bf16 %v571_v13, %v1208_v2  ;;  %v590_v31 = vpop.permute.xlu0 %589  ;;  %v576_v3 = vpop.permute.xlu1 %575  ;;  %v632_v27 = vpack.c.bf16 %v572_v15, %v1220_v12 }
 0x231   :  { %v582_v11 = vsel %vm215_vm7, %v576_v3, %v578_v55  ;;  %v583_v23 = vsel %vm215_vm7, %v574_v61, %v576_v3 }
 0x232   :  { %723 = vmatprep.subr.bf16.mxu1 %v632_v27  ;;  %v585_v17 = vmul.f32 %v583_v23, %v1123_v49  ;;  %v586_v12 = vmul.f32 %v582_v11, %v1141_v6 }
 0x233   :  { %724 = vmatpush1.bf16.msra.mxu1 %v631_v20 }
 0x234   :  { %v594_v4 = vpop.permute.xlu0 %593  ;;  %v580_v36 = vpop.permute.xlu1 %579 }
 0x235   :  { %v581_v25 = vsel %vm215_vm7, %v578_v55, %v580_v36  ;;  %v584_v39 = vsel %vm215_vm7, %v580_v36, %v574_v61 }
 0x236   :  { %v587_v6 = vmul.f32 %v581_v25, %v1144_v9 }
 0x238   :  { %v592_v29 = vpop.permute.xlu1 %591  ;;  %v606_v38 = vpop.permute.xlu0 %605 }
 0x239   :  { %v598_v19 = vsel %vm248_vm6, %v592_v29, %v594_v4  ;;  %v599_v2 = vsel %vm248_vm6, %v590_v31, %v592_v29 }
 0x23a   :  { %v601_v42 = vmul.f32 %v599_v2, %v1096_v30  ;;  %v602_v24 = vmul.f32 %v598_v19, %v1114_v45  ;;  %v588_v30 = vmul.f32 %v584_v39, %v1138_v5 }
 0x23c   :  { %v633_v21 = vpack.c.bf16 %v601_v42, %v585_v17  ;;  %v596_v22 = vpop.permute.xlu1 %595  ;;  %v634_v18 = vpack.c.bf16 %v602_v24, %v586_v12  ;;  %v610_v44 = vpop.permute.xlu0 %609 }
 0x23d   :  { %v597_v41 = vsel %vm248_vm6, %v594_v4, %v596_v22  ;;  %v600_v49 = vsel %vm248_vm6, %v596_v22, %v590_v31 }
 0x23e   :  { %v603_v45 = vmul.f32 %v597_v41, %v1117_v46  ;;  %v604_v43 = vmul.f32 %v600_v49, %v1105_v37  ;;  %682 = vmatprep.subr.bf16.mxu0 %v634_v18 }
 0x23f   :  { %683 = vmatpush1.bf16.msra.mxu0 %v633_v21 }
 0x240   :  { %v635_v50 = vpack.c.bf16 %v603_v45, %v587_v6  ;;  %v608_v51 = vpop.permute.xlu1 %607  ;;  %v636_v52 = vpack.c.bf16 %v604_v43, %v588_v30 }
 0x241   :  { %v614_v47 = vsel %vm281_vm8, %v608_v51, %v610_v44  ;;  %v615_v28 = vsel %vm281_vm8, %v606_v38, %v608_v51 }
 0x242   :  { %v617_v9 = vmul.f32 %v1160_v48, %v615_v28  ;;  %v618_v5 = vmul.f32 %v1185_v0, %v614_v47  ;;  %725 = vmatprep.subr.bf16.mxu1 %v636_v52  ;;  %v808_v0 = vld [vmem:[%s1419_s4] sm:$0xff]  }
 0x243   :  { %726 = vmatpush1.bf16.msra.mxu1 %v635_v50 }
 0x244   :  { %v637_v46 = vpack.c.bf16 %v617_v9, %v617_v9  ;;  %v638_v37 = vpack.c.bf16 %v618_v5, %v618_v5  ;;  %v612_v53 = vpop.permute.xlu1 %611 }
 0x245   :  { %v613_v56 = vsel %vm281_vm8, %v610_v44, %v612_v53  ;;  %v616_v40 = vsel %vm281_vm8, %v612_v53, %v606_v38 }
 0x246   :  { %v619_v58 = vmul.f32 %v1190_v10, %v613_v56  ;;  %v620_v57 = vmul.f32 %v1180_v8, %v616_v40  ;;  %791 = vmatprep.subr.msk.bf16.mxu0 %vm354_vm3, %v638_v37  ;;  %v665_v48 = vsel %vm354_vm3, %v637_v46, 0 }
 0x247   :  { %685 = vmatpush1.bf16.msra.mxu0 %v665_v48 }
 0x248   :  { %v639_v60 = vpack.c.bf16 %v619_v58, %v619_v58  ;;  %v640_v61 = vpack.c.bf16 %v620_v57, %v620_v57 }
 0x24a   :  { %792 = vmatmul.mubr.msk.bf16.vlgmr.msra.gmra.mrb[4].mxu0 %vm660_vm11, %v808_v0  ;;  %793 = vmatprep.subr.msk.bf16.mxu1 %vm354_vm3, %v640_v61  ;;  %v671_v14 = vsel %vm354_vm3, %v639_v60, 0 }
 0x24b   :  { %728 = vmatpush1.bf16.msra.mxu1 %v671_v14 }
 0x24d   :  { %v648_v8 = vpop.permute.xlu0 %647 }
 0x24e   :  { %794 = vmatmul.mubr.msk.bf16.vlgmr.msra.gmra.mrb[4].mxu1 %vm660_vm11, %v808_v0 }
 0x255   :  { %v653_v33 = vpop.permute.xlu1 %652 }
 0x31d   :  { %v710_v10 = vpop.f32.mrb[4].mxu0 }
 0x31e   :  { %v711_v35 = vadd.f32 %v710_v10, %v648_v8  ;;  %v712_v26 = vpop.f32.mrb[5].mxu0 }
 0x31f   :  { %v713_v16 = vadd.f32 %v712_v26, %v648_v8  ;;  %v714_v54 = vpop.f32.mrb[6].mxu0 }
 0x320   :  { %v762_v59 = vmax.f32 %v711_v35, 0.0  ;;  %v716_v32 = vpop.f32.mrb[7].mxu0  ;;  %v715_v34 = vadd.f32 %v714_v54, %v653_v33 }
 0x321   :  { %v763_v55 = vmax.f32 %v713_v16, 0.0  ;;  %v753_v62 = vpop.f32.mrb[4].mxu1  ;;  %v717_v63 = vadd.f32 %v716_v32, %v653_v33 }
 0x322   :  { %770 = vst [vmem:[%s1421_s6] sm:$0xff] %v762_v59  ;;  %v754_v1 = vadd.f32 %v753_v62, %v648_v8  ;;  %v766_v7 = vmax.f32 %v715_v34, 0.0  ;;  %v755_v13 = vpop.f32.mrb[5].mxu1 }
 0x323   :  { %771 = vst [vmem:[%s1421_s6 + $0x8] sm:$0xff] %v763_v55  ;;  %v767_v15 = vmax.f32 %v717_v63, 0.0  ;;  %v756_v20 = vadd.f32 %v755_v13, %v648_v8  ;;  %v757_v31 = vpop.f32.mrb[6].mxu1 }
 0x324   :  { %v764_v3 = vmax.f32 %v754_v1, 0.0  ;;  %774 = vst [vmem:[%s1421_s6 + $0x20] sm:$0xff] %v766_v7  ;;  %v758_v27 = vadd.f32 %v757_v31, %v653_v33  ;;  %v759_v4 = vpop.f32.mrb[7].mxu1 }
 0x325   :  { %775 = vst [vmem:[%s1421_s6 + $0x28] sm:$0xff] %v767_v15  ;;  %v765_v36 = vmax.f32 %v756_v20, 0.0  ;;  %v760_v11 = vadd.f32 %v759_v4, %v653_v33 }
 0x326   :  { %772 = vst [vmem:[%s1421_s6 + $0x10] sm:$0xff] %v764_v3  ;;  %v768_v23 = vmax.f32 %v758_v27, 0.0 }
 0x327   :  { %773 = vst [vmem:[%s1421_s6 + $0x18] sm:$0xff] %v765_v36  ;;  %v769_v29 = vmax.f32 %v760_v11, 0.0 }
 0x328   :  { %776 = vst [vmem:[%s1421_s6 + $0x30] sm:$0xff] %v768_v23 }
 0x329   :  { %777 = vst [vmem:[%s1421_s6 + $0x38] sm:$0xff] %v769_v29 }

</bundles_post_ra>
